<compile_context>
chip_gen: v7x
topology: tpu7x:2x2x1
jax: 0.10.0
libtpu: 0.0.40
codegen_flags: <defaults>
</compile_context>

<pallas_src>
import functools

import jax
import jax.numpy as jnp
from jax import lax
from jax.experimental import pallas as pl
from jax.experimental.pallas import tpu as pltpu


def _softplus(z):
    # Numerically stable softplus = log(1 + exp(z)); exp/log go to the EUP, rest is VPU.
    return jnp.maximum(z, 0.0) + jnp.log(1.0 + jnp.exp(-jnp.abs(z)))


def actor_kernel(x_ref,
                 w1_ref, b1_ref,
                 w2_ref, b2_ref,
                 w3_ref, b3_ref,
                 wh_ref, bh_ref,
                 o_ref, *, n_out):
    # Shared trunk: three ReLU(linear) stages on the MXU/VPU, all VMEM-resident.
    x = x_ref[...]
    h = jnp.maximum(
        jnp.dot(x, w1_ref[...], preferred_element_type=jnp.float32) + b1_ref[...], 0.0)
    h = jnp.maximum(
        jnp.dot(h, w2_ref[...], preferred_element_type=jnp.float32) + b2_ref[...], 0.0)
    h = jnp.maximum(
        jnp.dot(h, w3_ref[...], preferred_element_type=jnp.float32) + b3_ref[...], 0.0)

    # Fused (mu | sigma | zero-pad) head: a single MXU pass producing a lane-dense
    # (TB, 128) tile instead of two 1..n_out-lane matmuls with masked stores.
    z = jnp.dot(h, wh_ref[...], preferred_element_type=jnp.float32) + bh_ref[...]

    col = lax.broadcasted_iota(jnp.int32, z.shape, 1)
    mu = jnp.tanh(z)
    sigma = jnp.clip(_softplus(z), 1e-4, 2.0)
    # Columns [0, n_out) are the mu head, [n_out, 2*n_out) the sigma head; padding lanes
    # hold junk and are sliced away in the wrapper.
    o_ref[...] = jnp.where(col < n_out, mu, sigma).astype(o_ref.dtype)


def actor_forward(x, params, *, block_batch=512):
    """params = (w1, b1, w2, b2, w3, b3, w_mu, b_mu, w_sigma, b_sigma).

    Weights are (in, out); biases are (1, out). Returns (mu, sigma), each (batch, n_out).
    """
    (w1, b1, w2, b2, w3, b3, w_mu, b_mu, w_sigma, b_sigma) = params

    if x.ndim == 1:            # eval-mode single state, like the PyTorch module's unsqueeze(0)
        x = x[None, :]
    x = x.astype(jnp.float32)

    batch, n_inputs = x.shape
    n_hidden = w1.shape[1]
    n_out = w_mu.shape[1]

    # --- fuse + lane-pad the two heads (done once in the wrapper, outside the kernel) ---
    head_pad = 128 * pl.cdiv(2 * n_out, 128)
    wh = jnp.zeros((n_hidden, head_pad), jnp.float32)
    wh = wh.at[:, :n_out].set(w_mu).at[:, n_out:2 * n_out].set(w_sigma)
    bh = jnp.zeros((1, head_pad), jnp.float32)
    bh = bh.at[:, :n_out].set(b_mu).at[:, n_out:2 * n_out].set(b_sigma)

    # --- batch tiling: tile is a multiple of 8 sublanes; grid axis is "parallel" ---
    pb = 8 * pl.cdiv(batch, 8)
    if pb <= block_batch:
        tb = pb
    else:
        tb = block_batch
        pb = tb * pl.cdiv(pb, tb)
    if pb != batch:
        x = jnp.pad(x, ((0, pb - batch), (0, 0)))
    nb = pb // tb

    kernel = functools.partial(actor_kernel, n_out=n_out)

    def full(a):
        return pl.BlockSpec(a.shape, lambda i: (0, 0))

    weights = (w1, b1, w2, b2, w3, b3, wh, bh)

    out = pl.pallas_call(
        kernel,
        out_shape=jax.ShapeDtypeStruct((pb, head_pad), jnp.float32),
        grid=(nb,),
        in_specs=[pl.BlockSpec((tb, n_inputs), lambda i: (i, 0))]
                 + [full(a) for a in weights],
        out_specs=pl.BlockSpec((tb, head_pad), lambda i: (i, 0)),
        compiler_params=pltpu.CompilerParams(
            dimension_semantics=("parallel",)),
    )(x, *weights)

    mu = out[:batch, :n_out]
    sigma = out[:batch, n_out:2 * n_out]
    return mu, sigma


def init_actor_params(key, n_inputs, n_hidden, n_out):
    """Deterministic PyTorch-style Linear init: U(-1/sqrt(fan_in), 1/sqrt(fan_in))."""
    dims = [(n_inputs, n_hidden), (n_hidden, n_hidden), (n_hidden, n_hidden),
            (n_hidden, n_out), (n_hidden, n_out)]
    params = []
    for fan_in, fan_out in dims:
        key, kw, kb = jax.random.split(key, 3)
        bound = 1.0 / (fan_in ** 0.5)
        w = jax.random.uniform(kw, (fan_in, fan_out), jnp.float32, -bound, bound)
        b = jax.random.uniform(kb, (1, fan_out), jnp.float32, -bound, bound)
        params.extend([w, b])
    return tuple(params)


def actor_reference(x, params):
    (w1, b1, w2, b2, w3, b3, w_mu, b_mu, w_sigma, b_sigma) = params
    if x.ndim == 1:
        x = x[None, :]
    h = jnp.maximum(x @ w1 + b1, 0.0)
    h = jnp.maximum(h @ w2 + b2, 0.0)
    h = jnp.maximum(h @ w3 + b3, 0.0)
    mu = jnp.tanh(h @ w_mu + b_mu)
    sigma = jnp.clip(jax.nn.softplus(h @ w_sigma + b_sigma), 1e-4, 2.0)
    return mu, sigma


if __name__ == "__main__":
    # Small shapes consistent with the module: state vector -> hidden -> (mu, sigma) heads.
    batch, n_inputs, n_hidden, n_out = 8, 8, 32, 2

    key = jax.random.PRNGKey(0)
    key, kx = jax.random.split(key)
    x = jax.random.normal(kx, (batch, n_inputs), jnp.float32)

    params = init_actor_params(key, n_inputs, n_hidden, n_out)

    mu, sigma = actor_forward(x, params)
    mu, sigma = jax.block_until_ready((mu, sigma))

    mu_ref, sigma_ref = actor_reference(x, params)
    assert mu.shape == (batch, n_out) and sigma.shape == (batch, n_out)
    assert jnp.allclose(mu, mu_ref, atol=1e-5, rtol=1e-5), "mu mismatch vs reference"
    assert jnp.allclose(sigma, sigma_ref, atol=1e-5, rtol=1e-5), "sigma mismatch vs reference"

    # TODO(synk): optimizer (SGD) and the downstream torch.distributions usage are training-side
    # and intentionally not part of this forward kernel.
    print("KERNEL_OK")
</pallas_src>

<mosaic_0001>
module attributes {stable_mosaic.version = 11 : i64} {
  func.func @actor_kernel(%arg0: i32, %arg1: memref<8x8xf32, #tpu.memory_space<vmem>>, %arg2: memref<8x32xf32, #tpu.memory_space<vmem>>, %arg3: memref<1x32xf32, #tpu.memory_space<vmem>>, %arg4: memref<32x32xf32, #tpu.memory_space<vmem>>, %arg5: memref<1x32xf32, #tpu.memory_space<vmem>>, %arg6: memref<32x32xf32, #tpu.memory_space<vmem>>, %arg7: memref<1x32xf32, #tpu.memory_space<vmem>>, %arg8: memref<32x128xf32, #tpu.memory_space<vmem>>, %arg9: memref<1x128xf32, #tpu.memory_space<vmem>>, %arg10: memref<8x128xf32, #tpu.memory_space<vmem>>) attributes {dimension_semantics = [#tpu.dimension_semantics<parallel>], iteration_bounds = array<i64: 1>, scalar_prefetch = 0 : i64, scratch_operands = 0 : i64, tpu.core_type = #tpu.core_type<tc>, window_params = [{transform_indices = @transform_0, window_bounds = array<i64: 8, 8>}, {pipeline_mode = #tpu.pipeline_mode<synchronous>, transform_indices = @transform_1, window_bounds = array<i64: 8, 32>}, {pipeline_mode = #tpu.pipeline_mode<synchronous>, transform_indices = @transform_2, window_bounds = array<i64: 1, 32>}, {pipeline_mode = #tpu.pipeline_mode<synchronous>, transform_indices = @transform_3, window_bounds = array<i64: 32, 32>}, {pipeline_mode = #tpu.pipeline_mode<synchronous>, transform_indices = @transform_4, window_bounds = array<i64: 1, 32>}, {pipeline_mode = #tpu.pipeline_mode<synchronous>, transform_indices = @transform_5, window_bounds = array<i64: 32, 32>}, {pipeline_mode = #tpu.pipeline_mode<synchronous>, transform_indices = @transform_6, window_bounds = array<i64: 1, 32>}, {pipeline_mode = #tpu.pipeline_mode<synchronous>, transform_indices = @transform_7, window_bounds = array<i64: 32, 128>}, {pipeline_mode = #tpu.pipeline_mode<synchronous>, transform_indices = @transform_8, window_bounds = array<i64: 1, 128>}, {transform_indices = @transform_9, window_bounds = array<i64: 8, 128>}]} {
    %c0 = arith.constant 0 : index
    %c0_0 = arith.constant 0 : index
    %0 = vector.load %arg1[%c0, %c0_0] : memref<8x8xf32, #tpu.memory_space<vmem>>, vector<8x8xf32>
    %c0_1 = arith.constant 0 : index
    %c0_2 = arith.constant 0 : index
    %1 = vector.load %arg2[%c0_1, %c0_2] : memref<8x32xf32, #tpu.memory_space<vmem>>, vector<8x32xf32>
    %cst = arith.constant dense<0.000000e+00> : vector<8x32xf32>
    %2 = tpu.matmul %0, %1, %cst {dimension_numbers = #tpu.dot_dimension_numbers<[1], [0], [0], [1], [0, 0, 1, 1], [], []>} : vector<8x8xf32>, vector<8x32xf32>, vector<8x32xf32> -> vector<8x32xf32>
    %c0_3 = arith.constant 0 : index
    %c0_4 = arith.constant 0 : index
    %3 = vector.load %arg3[%c0_3, %c0_4] : memref<1x32xf32, #tpu.memory_space<vmem>>, vector<1x32xf32>
    %4 = vector.broadcast %3 : vector<1x32xf32> to vector<8x32xf32>
    %5 = arith.addf %2, %4 : vector<8x32xf32>
    %cst_5 = arith.constant 0.000000e+00 : f32
    %6 = vector.broadcast %cst_5 : f32 to vector<8x32xf32>
    %7 = arith.maximumf %5, %6 : vector<8x32xf32>
    %c0_6 = arith.constant 0 : index
    %c0_7 = arith.constant 0 : index
    %8 = vector.load %arg4[%c0_6, %c0_7] : memref<32x32xf32, #tpu.memory_space<vmem>>, vector<32x32xf32>
    %cst_8 = arith.constant dense<0.000000e+00> : vector<8x32xf32>
    %9 = tpu.matmul %7, %8, %cst_8 {dimension_numbers = #tpu.dot_dimension_numbers<[1], [0], [0], [1], [0, 0, 1, 1], [], []>} : vector<8x32xf32>, vector<32x32xf32>, vector<8x32xf32> -> vector<8x32xf32>
    %c0_9 = arith.constant 0 : index
    %c0_10 = arith.constant 0 : index
    %10 = vector.load %arg5[%c0_9, %c0_10] : memref<1x32xf32, #tpu.memory_space<vmem>>, vector<1x32xf32>
    %11 = vector.broadcast %10 : vector<1x32xf32> to vector<8x32xf32>
    %12 = arith.addf %9, %11 : vector<8x32xf32>
    %cst_11 = arith.constant 0.000000e+00 : f32
    %13 = vector.broadcast %cst_11 : f32 to vector<8x32xf32>
    %14 = arith.maximumf %12, %13 : vector<8x32xf32>
    %c0_12 = arith.constant 0 : index
    %c0_13 = arith.constant 0 : index
    %15 = vector.load %arg6[%c0_12, %c0_13] : memref<32x32xf32, #tpu.memory_space<vmem>>, vector<32x32xf32>
    %cst_14 = arith.constant dense<0.000000e+00> : vector<8x32xf32>
    %16 = tpu.matmul %14, %15, %cst_14 {dimension_numbers = #tpu.dot_dimension_numbers<[1], [0], [0], [1], [0, 0, 1, 1], [], []>} : vector<8x32xf32>, vector<32x32xf32>, vector<8x32xf32> -> vector<8x32xf32>
    %c0_15 = arith.constant 0 : index
    %c0_16 = arith.constant 0 : index
    %17 = vector.load %arg7[%c0_15, %c0_16] : memref<1x32xf32, #tpu.memory_space<vmem>>, vector<1x32xf32>
    %18 = vector.broadcast %17 : vector<1x32xf32> to vector<8x32xf32>
    %19 = arith.addf %16, %18 : vector<8x32xf32>
    %cst_17 = arith.constant 0.000000e+00 : f32
    %20 = vector.broadcast %cst_17 : f32 to vector<8x32xf32>
    %21 = arith.maximumf %19, %20 : vector<8x32xf32>
    %c0_18 = arith.constant 0 : index
    %c0_19 = arith.constant 0 : index
    %22 = vector.load %arg8[%c0_18, %c0_19] : memref<32x128xf32, #tpu.memory_space<vmem>>, vector<32x128xf32>
    %cst_20 = arith.constant dense<0.000000e+00> : vector<8x128xf32>
    %23 = tpu.matmul %21, %22, %cst_20 {dimension_numbers = #tpu.dot_dimension_numbers<[1], [0], [0], [1], [0, 0, 1, 1], [], []>} : vector<8x32xf32>, vector<32x128xf32>, vector<8x128xf32> -> vector<8x128xf32>
    %c0_21 = arith.constant 0 : index
    %c0_22 = arith.constant 0 : index
    %24 = vector.load %arg9[%c0_21, %c0_22] : memref<1x128xf32, #tpu.memory_space<vmem>>, vector<1x128xf32>
    %25 = vector.broadcast %24 : vector<1x128xf32> to vector<8x128xf32>
    %26 = arith.addf %23, %25 : vector<8x128xf32>
    %27 = tpu.iota {dimensions = array<i32: 1>} : vector<8x128xi32>
    %28 = math.tanh %26 : vector<8x128xf32>
    %cst_23 = arith.constant 0.000000e+00 : f32
    %29 = vector.broadcast %cst_23 : f32 to vector<8x128xf32>
    %30 = arith.maximumf %26, %29 : vector<8x128xf32>
    %31 = math.absf %26 : vector<8x128xf32>
    %cst_24 = arith.constant 0.000000e+00 : f32
    %32 = vector.broadcast %cst_24 : f32 to vector<8x128xf32>
    %33 = arith.subf %32, %31 : vector<8x128xf32>
    %34 = math.exp %33 : vector<8x128xf32>
    %cst_25 = arith.constant 1.000000e+00 : f32
    %35 = vector.broadcast %cst_25 : f32 to vector<8x128xf32>
    %36 = arith.addf %35, %34 : vector<8x128xf32>
    %37 = math.log %36 : vector<8x128xf32>
    %38 = arith.addf %30, %37 : vector<8x128xf32>
    %cst_26 = arith.constant 9.99999974E-5 : f32
    %cst_27 = arith.constant 2.000000e+00 : f32
    %39 = vector.broadcast %cst_26 : f32 to vector<8x128xf32>
    %40 = arith.maximumf %39, %38 : vector<8x128xf32>
    %41 = vector.broadcast %cst_27 : f32 to vector<8x128xf32>
    %42 = arith.minimumf %41, %40 : vector<8x128xf32>
    %c2_i32 = arith.constant 2 : i32
    %43 = vector.broadcast %c2_i32 : i32 to vector<8x128xi32>
    %44 = arith.cmpi slt, %27, %43 : vector<8x128xi32>
    %45 = arith.select %44, %28, %42 : vector<8x128xi1>, vector<8x128xf32>
    %c0_28 = arith.constant 0 : index
    %c0_29 = arith.constant 0 : index
    %46 = vector.load %arg10[%c0_28, %c0_29] : memref<8x128xf32, #tpu.memory_space<vmem>>, vector<8x128xf32>
    tpu.vector_store %arg10[%c0_28, %c0_29], %45 {strides = array<i32>} : memref<8x128xf32, #tpu.memory_space<vmem>>, vector<8x128xf32>,
    return
  }
  func.func @transform_0(%arg0: i32) -> (i32, i32) {
    %c0_i32 = arith.constant 0 : i32
    %c0_i32_0 = arith.constant 0 : i32
    return %arg0, %c0_i32 : i32, i32
  }
  func.func @transform_1(%arg0: i32) -> (i32, i32) {
    %c0_i32 = arith.constant 0 : i32
    %c0_i32_0 = arith.constant 0 : i32
    %c0_i32_1 = arith.constant 0 : i32
    return %c0_i32, %c0_i32_0 : i32, i32
  }
  func.func @transform_2(%arg0: i32) -> (i32, i32) {
    %c0_i32 = arith.constant 0 : i32
    %c0_i32_0 = arith.constant 0 : i32
    %c0_i32_1 = arith.constant 0 : i32
    return %c0_i32, %c0_i32_0 : i32, i32
  }
  func.func @transform_3(%arg0: i32) -> (i32, i32) {
    %c0_i32 = arith.constant 0 : i32
    %c0_i32_0 = arith.constant 0 : i32
    %c0_i32_1 = arith.constant 0 : i32
    return %c0_i32, %c0_i32_0 : i32, i32
  }
  func.func @transform_4(%arg0: i32) -> (i32, i32) {
    %c0_i32 = arith.constant 0 : i32
    %c0_i32_0 = arith.constant 0 : i32
    %c0_i32_1 = arith.constant 0 : i32
    return %c0_i32, %c0_i32_0 : i32, i32
  }
  func.func @transform_5(%arg0: i32) -> (i32, i32) {
    %c0_i32 = arith.constant 0 : i32
    %c0_i32_0 = arith.constant 0 : i32
    %c0_i32_1 = arith.constant 0 : i32
    return %c0_i32, %c0_i32_0 : i32, i32
  }
  func.func @transform_6(%arg0: i32) -> (i32, i32) {
    %c0_i32 = arith.constant 0 : i32
    %c0_i32_0 = arith.constant 0 : i32
    %c0_i32_1 = arith.constant 0 : i32
    return %c0_i32, %c0_i32_0 : i32, i32
  }
  func.func @transform_7(%arg0: i32) -> (i32, i32) {
    %c0_i32 = arith.constant 0 : i32
    %c0_i32_0 = arith.constant 0 : i32
    %c0_i32_1 = arith.constant 0 : i32
    return %c0_i32, %c0_i32_0 : i32, i32
  }
  func.func @transform_8(%arg0: i32) -> (i32, i32) {
    %c0_i32 = arith.constant 0 : i32
    %c0_i32_0 = arith.constant 0 : i32
    %c0_i32_1 = arith.constant 0 : i32
    return %c0_i32, %c0_i32_0 : i32, i32
  }
  func.func @transform_9(%arg0: i32) -> (i32, i32) {
    %c0_i32 = arith.constant 0 : i32
    %c0_i32_0 = arith.constant 0 : i32
    return %arg0, %c0_i32 : i32, i32
  }
}

</mosaic_0001>

<bundles_post_ra>
// kernel: tpu_custom_call.1
= control target key start
LH: loop header
LB: loop body
LE: loop exit
PB: predicated region body
PF: predicated region fallthrough
CT: control target
= control target key end

     0   :  { %14 = vsyncpa [#allocation3], 0  ;;  %s869_s0 = inlined_call_operand.hbm [shape: f32[8,8], index: 0, kind: input, shape index: {}]   ;;  %s870_s1 = inlined_call_operand.hbm [shape: f32[8,32], index: 1, kind: input, shape index: {}]   ;;  %s871_s2 = inlined_call_operand.vmem [shape: f32[1,32], index: 2, kind: input, shape index: {}]   ;;  %s872_s3 = inlined_call_operand.hbm [shape: f32[32,32], index: 3, kind: input, shape index: {}]   ;;  %s873_s4 = inlined_call_operand.vmem [shape: f32[1,32], index: 4, kind: input, shape index: {}]   ;;  %s874_s5 = inlined_call_operand.hbm [shape: f32[32,32], index: 5, kind: input, shape index: {}]   ;;  %s875_s6 = inlined_call_operand.vmem [shape: f32[1,32], index: 6, kind: input, shape index: {}]   ;;  %s876_s7 = inlined_call_operand.hbm [shape: f32[32,128], index: 7, kind: input, shape index: {}]   ;;  %s877_s8 = inlined_call_operand.vmem [shape: f32[1,128], index: 8, kind: input, shape index: {}]   ;;  %s878_s9 = inlined_call_operand.hbm [shape: f32[8,128], index: 9, kind: output, shape index: {}]  }
   0x1   :  { %15 = vsyncpa [#allocation6], 0 }
   0x2   :  { %16 = vsyncpa [#allocation9], 0 }
   0x3   :  { %17 = vsyncpa [#allocation4], 0  ;;  %s708_s30 = smov [#allocation5]   ;;  %s568_s13 = scalar_lea.hbm %s870_s1, 128 }
   0x4   :  { %s34_s10 = sshll.u32 %s708_s30, 4  ;;  %p569_p0 = scmp.ne.s32.totalorder %s870_s1, %s568_s13  ;;  %s35_s10 = int_to_ptr.vmem [resolvable:$true] %s34_s10 }
   0x5   :  { %p572_p1 = scmp.lt.u32.totalorder %s568_s13, %s870_s1 }
   0x7   :  { %p574_p2 = pnand %p572_p1, %p569_p0 }
   0x9   :  { %577 = shalt.err (!%p574_p2)
}
   0xa   :  { %s578_s18 = scalar_lea.vmem %s35_s10, 128  ;;  %p583_p4 = scmp.lt.s32.totalorder %s35_s10, %s35_s10 }
   0xb   :  { %p579_p3 = scmp.ne.s32.totalorder %s35_s10, %s578_s18  ;;  %p584_p5 = scmp.lt.s32.totalorder %s578_s18, %s578_s18 }
   0xd   :  { %p585_p6 = por %p584_p5, %p583_p4 }
   0xf   :  { %p586_p7 = pnand %p585_p6, %p579_p3 }
  0x11   :  { %589 = shalt.err (!%p586_p7)
}
  0x12   :  { %37 = dma.hbm_to_vmem [thread:$0]  %s870_s1, 128, %s35_s10, [#allocation6]  }
  0x13   :  { %s709_s21 = smov [#allocation8]   ;;  %s710_s23 = smov [#allocation2]  }
  0x14   :  { %s59_s22 = sshll.u32 %s709_s21, 4  ;;  %s24_s24 = sshll.u32 %s710_s23, 4  ;;  %s60_s22 = int_to_ptr.vmem [resolvable:$true] %s59_s22  ;;  %s25_s24 = int_to_ptr.vmem [resolvable:$true] %s24_s24 }
  0x15   :  { %s590_s27 = scalar_lea.hbm %s874_s5, 512 }
  0x16   :  { %p591_p8 = scmp.ne.s32.totalorder %s874_s5, %s590_s27  ;;  %p594_p9 = scmp.lt.u32.totalorder %s590_s27, %s874_s5 }
  0x18   :  { %p596_p10 = pnand %p594_p9, %p591_p8 }
  0x1a   :  { %599 = shalt.err (!%p596_p10)
}
  0x1b   :  { %s600_s1 = scalar_lea.vmem %s60_s22, 512  ;;  %p605_p12 = scmp.lt.s32.totalorder %s60_s22, %s60_s22 }
  0x1c   :  { %p601_p11 = scmp.ne.s32.totalorder %s60_s22, %s600_s1  ;;  %p606_p13 = scmp.lt.s32.totalorder %s600_s1, %s600_s1 }
  0x1e   :  { %p607_p0 = por %p606_p13, %p605_p12 }
  0x20   :  { %p608_p1 = pnand %p607_p0, %p601_p11 }
  0x22   :  { %611 = shalt.err (!%p608_p1)
}
  0x23   :  { %s711_s10 = smov 128   ;;  %s712_s12 = smov 8  }
  0x24   :  { %65 = dma.hbm_to_vmem [thread:$0]  %s874_s5, 512, %s60_s22, [#allocation9], %s711_s10, %s711_s10, %s712_s12  }
  0x25   :  { %s612_s17 = scalar_lea.hbm %s869_s0, 128 }
  0x26   :  { %p613_p2 = scmp.ne.s32.totalorder %s869_s0, %s612_s17  ;;  %p616_p3 = scmp.lt.u32.totalorder %s612_s17, %s869_s0 }
  0x28   :  { %p618_p4 = pnand %p616_p3, %p613_p2 }
  0x2a   :  { %621 = shalt.err (!%p618_p4)
}
  0x2b   :  { %s622_s23 = scalar_lea.vmem %s25_s24, 128  ;;  %p627_p6 = scmp.lt.s32.totalorder %s25_s24, %s25_s24 }
  0x2c   :  { %p623_p5 = scmp.ne.s32.totalorder %s25_s24, %s622_s23  ;;  %p628_p7 = scmp.lt.s32.totalorder %s622_s23, %s622_s23 }
  0x2e   :  { %p629_p8 = por %p628_p7, %p627_p6 }
  0x30   :  { %p630_p9 = pnand %p629_p8, %p623_p5 }
  0x32   :  { %633 = shalt.err (!%p630_p9)
}
  0x33   :  { %27 = dma.hbm_to_vmem [thread:$0]  %s869_s0, 128, %s25_s24, [#allocation3]  }
  0x34   :  { %s713_s25 = smov [#allocation7]   ;;  %s714_s27 = smov [#allocation10]  }
  0x35   :  { %s45_s26 = sshll.u32 %s713_s25, 4  ;;  %s73_s28 = sshll.u32 %s714_s27, 4  ;;  %s46_s26 = int_to_ptr.vmem [resolvable:$true] %s45_s26  ;;  %s74_s28 = int_to_ptr.vmem [resolvable:$true] %s73_s28 }
  0x36   :  { %s634_s11 = scalar_lea.hbm %s872_s3, 512 }
  0x37   :  { %p635_p10 = scmp.ne.s32.totalorder %s872_s3, %s634_s11  ;;  %p638_p11 = scmp.lt.u32.totalorder %s634_s11, %s872_s3 }
  0x39   :  { %p640_p12 = pnand %p638_p11, %p635_p10 }
  0x3b   :  { %643 = shalt.err (!%p640_p12)
}
  0x3c   :  { %s644_s0 = scalar_lea.vmem %s46_s26, 512  ;;  %p649_p0 = scmp.lt.s32.totalorder %s46_s26, %s46_s26 }
  0x3d   :  { %p645_p13 = scmp.ne.s32.totalorder %s46_s26, %s644_s0  ;;  %p650_p1 = scmp.lt.s32.totalorder %s644_s0, %s644_s0 }
  0x3f   :  { %p651_p2 = por %p650_p1, %p649_p0 }
  0x41   :  { %p652_p3 = pnand %p651_p2, %p645_p13 }
  0x43   :  { %655 = shalt.err (!%p652_p3)
}
  0x44   :  { %51 = dma.hbm_to_vmem [thread:$0]  %s872_s3, 512, %s46_s26, [#allocation6], %s711_s10, %s711_s10, %s712_s12  }
  0x45   :  { %s656_s19 = scalar_lea.hbm %s876_s7, 512 }
  0x46   :  { %p657_p4 = scmp.ne.s32.totalorder %s876_s7, %s656_s19  ;;  %p660_p5 = scmp.lt.u32.totalorder %s656_s19, %s876_s7 }
  0x48   :  { %p662_p6 = pnand %p660_p5, %p657_p4 }
  0x4a   :  { %665 = shalt.err (!%p662_p6)
}
  0x4b   :  { %s666_s22 = scalar_lea.vmem %s74_s28, 512  ;;  %p671_p8 = scmp.lt.s32.totalorder %s74_s28, %s74_s28 }
  0x4c   :  { %p667_p7 = scmp.ne.s32.totalorder %s74_s28, %s666_s22  ;;  %p672_p9 = scmp.lt.s32.totalorder %s666_s22, %s666_s22 }
  0x4e   :  { %p673_p10 = por %p672_p9, %p671_p8 }
  0x50   :  { %p674_p11 = pnand %p673_p10, %p667_p7 }
  0x52   :  { %677 = shalt.err (!%p674_p11)
}
  0x53   :  { %79 = dma.hbm_to_vmem [thread:$0]  %s876_s7, 512, %s74_s28, [#allocation9], %s711_s10, %s711_s10, %s712_s12  }
  0x54   :  { %700 = dma.done.wait [#allocation3], 128  }
  0x55   :  { %701 = vsyncadd [#allocation3], 4294967168 }
  0x56   :  { %702 = dma.done.wait [#allocation6], 640  }
  0x57   :  { %703 = vsyncadd [#allocation6], 4294966656 }
  0x58   :  { %704 = dma.done.wait [#allocation9], 1024  }
  0x59   :  { %705 = vsyncadd [#allocation9], 4294966272  ;;  %v715_v0 = vmov 0.0   ;;  %vm716_vm0 = vmmov 0   ;;  %v717_v1 = vmov 0.0|0.0   ;;  %vm106_vm1 = vcmask 64512  }
  0x5a   :  { %495 = vmatprep.subr.mxu0 %v715_v0  ;;  %497 = vmatprep.mubr.msk.f32.mxu0 %vm716_vm0, %v715_v0  ;;  %v98_v2 = vld [vmem:[#allocation5] sm:$0xff]  ;;  %v97_v3 = vld [vmem:[#allocation2] sm:$0xff]  ;;  %v181_v4 = vld [vmem:[#allocation7] sm:$0xff]  ;;  %vm192_vm2 = vcmask 261120   ;;  %v436_v46 = vlaneseq }
  0x5b   :  { %533 = vmatprep.subr.bf16.mxu1 %v717_v1  ;;  %508 = vmatprep.mubr.msk.f32.mxu1 %vm716_vm0, %v715_v0  ;;  %v182_v5 = vld [vmem:[#allocation7 + $0x8] sm:$0xff]  ;;  %v183_v7 = vld [vmem:[#allocation7 + $0x10] sm:$0xff]  ;;  %v184_v8 = vld [vmem:[#allocation7 + $0x18] sm:$0xff] }
  0x5c   :  { %496 = vmatpush3.msra.mxu0 %v98_v2  ;;  %v534_v6 = vpack.c.bf16 %v182_v5, %v181_v4  ;;  %v537_v9 = vpack.c.bf16 %v184_v8, %v183_v7  ;;  %v267_v10 = vld [vmem:[#allocation8] sm:$0xff]  ;;  %v268_v11 = vld [vmem:[#allocation8 + $0x8] sm:$0xff]  ;;  %v470_v13 = vld [vmem:[%s871_s2] ss:$0 sm:$0xff]  ;;  %v437_v50 = vand.u32 127, %v436_v46 }
  0x5d   :  { %498 = vmatmul.mubr.msk.f32.vlgmr.msra.gmra.mrb[0].mxu0 %vm106_vm1, %v97_v3  ;;  %539 = vmatprep.subr.bf16.mxu0 %v717_v1  ;;  %v540_v12 = vpack.c.bf16 %v268_v11, %v267_v10  ;;  %v269_v18 = vld [vmem:[#allocation8 + $0x10] sm:$0xff]  ;;  %v270_v19 = vld [vmem:[#allocation8 + $0x18] sm:$0xff]  ;;  %v352_v21 = vld [vmem:[#allocation10] sm:$0xff] }
  0x5e   :  { %519 = vmatprep.mubr.msk.f32.mxu0 %vm716_vm0, %v715_v0  ;;  %535 = vmatpush3.bf16.msra.mxu1 %v534_v6  ;;  %v543_v20 = vpack.c.bf16 %v270_v19, %v269_v18  ;;  %v353_v22 = vld [vmem:[#allocation10 + $0x8] sm:$0xff]  ;;  %v472_v24 = vld [vmem:[%s873_s4] ss:$0 sm:$0xff]  ;;  %v355_v30 = vld [vmem:[#allocation10 + $0x18] sm:$0xff]  ;;  %vm450_vm3 = vcmp.lt.s32.totalorder %v437_v50, 2 }
  0x5f   :  { %536 = vmatprep.subr.bf16.mxu1 %v717_v1  ;;  %541 = vmatpush3.bf16.msra.mxu0 %v540_v12  ;;  %v546_v23 = vpack.c.bf16 %v353_v22, %v352_v21  ;;  %v354_v29 = vld [vmem:[#allocation10 + $0x10] sm:$0xff] }
  0x60   :  { %542 = vmatprep.subr.bf16.mxu0 %v717_v1  ;;  %v549_v31 = vpack.c.bf16 %v355_v30, %v354_v29  ;;  %v474_v32 = vld [vmem:[%s875_s6] ss:$0 sm:$0xff]  ;;  %s718_s6 = smov [#allocation11]  }
  0x61   :  { %v476_v37 = vld [vmem:[%s877_s8] ss:$0 sm:$0xff]  ;;  %s459_s8 = sshll.u32 %s718_s6, 4  ;;  %s460_s8 = int_to_ptr.vmem [resolvable:$true] %s459_s8 }
  0x62   :  { %538 = vmatpush3.bf16.msra.mxu1 %v537_v9  ;;  %s678_s29 = scalar_lea.vmem %s460_s8, 128  ;;  %p683_p13 = scmp.lt.s32.totalorder %s460_s8, %s460_s8 }
  0x63   :  { %545 = vmatprep.subr.bf16.mxu1 %v717_v1  ;;  %544 = vmatpush3.bf16.msra.mxu0 %v543_v20  ;;  %p679_p12 = scmp.ne.s32.totalorder %s460_s8, %s678_s29  ;;  %p684_p0 = scmp.lt.s32.totalorder %s678_s29, %s678_s29 }
  0x65   :  { %p685_p1 = por %p684_p0, %p683_p13 }
  0x67   :  { %p686_p2 = pnand %p685_p1, %p679_p12 }
 0x130   :  { %v176_v14 = vpop.f32.mrb[0].mxu0 }
 0x131   :  { %v177_v15 = vadd.f32 %v470_v13, %v176_v14  ;;  %v499_v16 = vpop.f32.mrb[1].mxu0 }
 0x133   :  { %v180_v17 = vmax.f32 %v177_v15, 0.0 }
 0x135   :  { %509 = vmatmul.mubr.msk.f32.vlgmr.msra.gmra.mrb[0].mxu1 %vm192_vm2, %v180_v17 }
 0x136   :  { %530 = vmatprep.mubr.msk.f32.mxu1 %vm716_vm0, %v715_v0  ;;  %547 = vmatpush3.bf16.msra.mxu1 %v546_v23 }
 0x137   :  { %548 = vmatprep.subr.bf16.mxu1 %v717_v1 }
 0x13a   :  { %550 = vmatpush3.bf16.msra.mxu1 %v549_v31 }
 0x208   :  { %v262_v25 = vpop.f32.mrb[0].mxu1 }
 0x209   :  { %v263_v26 = vadd.f32 %v472_v24, %v262_v25  ;;  %v510_v27 = vpop.f32.mrb[1].mxu1 }
 0x20b   :  { %v266_v28 = vmax.f32 %v263_v26, 0.0 }
 0x20d   :  { %520 = vmatmul.mubr.msk.f32.vlgmr.msra.gmra.mrb[2].mxu0 %vm192_vm2, %v266_v28 }
 0x2e0   :  { %v347_v33 = vpop.f32.mrb[2].mxu0 }
 0x2e1   :  { %v348_v34 = vadd.f32 %v474_v32, %v347_v33  ;;  %v521_v35 = vpop.f32.mrb[3].mxu0 }
 0x2e3   :  { %v351_v36 = vmax.f32 %v348_v34, 0.0 }
 0x2e5   :  { %531 = vmatmul.mubr.msk.f32.vlgmr.msra.gmra.mrb[2].mxu1 %vm192_vm2, %v351_v36 }
 0x3b8   :  { %v432_v38 = vpop.f32.mrb[2].mxu1 }
 0x3b9   :  { %v433_v39 = vadd.f32 %v476_v37, %v432_v38  ;;  %v532_v40 = vpop.f32.mrb[3].mxu1 }
 0x3bb   :  { %v440_v41 = vand.u32 2147483647, %v433_v39  ;;  %v439_v48 = vmax.f32 %v433_v39, 0.0 }
 0x3bd   :  { %v441_v42 = vsub.f32 0.0, %v440_v41 }
 0x3bf   :  { %v442_v43 = vmul.f32 1.442695, %v441_v42 }
 0x3c1   :  { %562 = vpow2.f32 %v442_v43 }
 0x3cb   :  { %v563_v44 = vpop.eup %562 }
 0x3cc   :  { %v444_v45 = vadd.f32 1.0, %v563_v44 }
 0x3ce   :  { %564 = vlog2.f32 %v444_v45 }
 0x3cf   :  { %566 = vtanh.f32 %v433_v39 }
 0x3d8   :  { %v565_v47 = vpop.eup %564 }
 0x3d9   :  { %v446_v49 = vmul.f32 0.6931472, %v565_v47  ;;  %v567_v54 = vpop.eup %566 }
 0x3db   :  { %v447_v51 = vadd.f32 %v446_v49, %v439_v48 }
 0x3dd   :  { %v448_v52 = vmax.f32 %v447_v51, 0.0001 }
 0x3df   :  { %v449_v53 = vmin.f32 %v448_v52, 2.0 }
 0x3e1   :  { %v451_v55 = vsel %vm450_vm3, %v567_v54, %v449_v53 }
 0x3e2   :  { %452 = vst [vmem:[#allocation11] sm:$0xff] %v451_v55 }
 0x3e3   :  { %689 = shalt.err (!%p686_p2)
}
 0x3e4   :  { %s690_s1 = scalar_lea.hbm %s878_s9, 128 }
 0x3e5   :  { %p691_p3 = scmp.ne.s32.totalorder %s878_s9, %s690_s1  ;;  %p694_p4 = scmp.lt.u32.totalorder %s690_s1, %s878_s9 }
 0x3e7   :  { %p696_p5 = pnand %p694_p4, %p691_p3 }
 0x3e9   :  { %699 = shalt.err (!%p696_p5)
}
 0x3ea   :  { %462 = dma.vmem_to_hbm [thread:$0]  %s460_s8, 128, %s878_s9, [#allocation4]  }
 0x3eb   :  { %706 = dma.done.wait [#allocation4], 128  }
 0x3ec   :  { %707 = vsyncadd [#allocation4], 4294967168 }
 0x3ed   :  { %466 = vsyncpa [#allocation3], 1 }
 0x3ee   :  { %467 = vsyncpa [#allocation6], 1 }
 0x3ef   :  { %468 = vsyncpa [#allocation9], 1 }
 0x3f0   :  { %469 = vsyncpa [#allocation4], 1 }

</bundles_post_ra>
